<compile_context>
chip_gen: v7x
topology: tpu7x:2x2x1
jax: 0.10.0
libtpu: 0.0.40
codegen_flags: <defaults>
</compile_context>

<pallas_src>
import functools

import jax
import jax.numpy as jnp
import numpy as np
from jax.experimental import pallas as pl
from jax.experimental.pallas import tpu as pltpu


def _round_up(x, m):
    return (x + m - 1) // m * m


def _gated_conv_kernel(xv_ref, xh_ref, col_ref, hemb_ref, w1_ref, b1_ref,
                       wv2h_ref, bv2h_ref, whr_ref, bhr_ref,
                       outv_ref, outh_ref, *,
                       dim, img_w, pk, hwp, taps_v, taps_h, residual):
    f32, bf16 = jnp.float32, jnp.bfloat16
    n = pl.program_id(0)

    col = col_ref[...]                       # (1, hwp) int32: x-coordinate of each lane
    xv = xv_ref[0]                           # (Cin, Lv) bf16, flattened top-padded x_v
    xh_in = xh_ref[0]                        # (Cin, Lh) f32 (residual) or bf16
    xh = xh_in.astype(bf16)

    def mask_cols(s, dx):
        # Zero the columns that the zero-padded conv would have read from outside
        # the row (the flat-offset slice wraps into the neighbouring row there).
        if dx < pk:
            s = jnp.where(col >= (pk - dx), s, jnp.zeros_like(s))
        elif dx > pk:
            s = jnp.where(col < (img_w - (dx - pk)), s, jnp.zeros_like(s))
        return s

    # Rebuild conv taps in VMEM: tap (dy, dx) of the vertical stack is a constant
    # flat offset dy*W + dx into the (top + halo) zero-padded flattened image.
    taps = []
    for dy, dx in taps_v:
        o = dy * img_w + dx
        taps.append(mask_cols(xv[:, o:o + hwp], dx))
    for dx in taps_h:                        # horizontal stack: offset dx, left mask only
        taps.append(mask_cols(xh[:, dx:dx + hwp], dx))
    k_in = jnp.concatenate(taps, axis=0)     # (Kv+Kh, hwp) bf16

    # Fused block-diagonal stage-1 matmul: rows [:2*dim] = vertical conv,
    # rows [2*dim:] = horizontal conv.  f32 accumulation, bias added once.
    h1 = jnp.dot(w1_ref[...], k_in, preferred_element_type=f32) + b1_ref[...]
    h_vert = h1[:2 * dim]
    h_horiz = h1[2 * dim:]

    he = hemb_ref[n]                         # (2*dim, 1) class embedding, lane-broadcasts

    def sigmoid(z):
        return 0.5 * jnp.tanh(0.5 * z) + 0.5   # single EUP push per element

    def gate(z):
        # GatedActivation: chunk channels in two, tanh(a) * sigmoid(b).
        return jnp.tanh(z[:dim]) * sigmoid(z[dim:])

    # out_v = gate(h_vert + h_emb)
    outv_ref[0] = gate(h_vert + he).astype(outv_ref.dtype)

    # vert_to_horiz 1x1 conv: single (2*dim, 2*dim) @ (2*dim, hwp) matmul
    v2h = jnp.dot(wv2h_ref[...], h_vert.astype(bf16),
                  preferred_element_type=f32) + bv2h_ref[...]
    out = gate(v2h + h_horiz + he)

    # horiz_resid 1x1 conv (+ residual)
    out_h = jnp.dot(whr_ref[...], out.astype(bf16),
                    preferred_element_type=f32) + bhr_ref[...]
    if residual:
        out_h = out_h + xh_in[:, pk:pk + hwp]   # exact f32 residual
    outh_ref[0] = out_h.astype(outh_ref.dtype)


def gated_masked_conv2d(x_v, x_h, h_labels, params, *, mask_type='B',
                        residual=True, kernel=3, out_dtype=None):
    # x_v, x_h: (N, Cin, H, W) float32; h_labels: (N,) int
    N, Cin, H, W = x_v.shape
    assert H == W, "module slicing implies square spatial dims"
    dim = params['w_hr'].shape[0]
    if residual:
        assert Cin == dim, "residual add requires in_dim == dim"
    pk = kernel // 2
    kh, kw, kw2 = pk + 1, kernel, pk + 1
    HW = H * W
    HWp = _round_up(HW, 128)                # lane-dense outputs: pad lanes, crop after
    f32, bf16 = jnp.float32, jnp.bfloat16
    out_dtype = x_v.dtype if out_dtype is None else out_dtype

    # Tap lists; mask 'A' (make_causal) zeroes the last vertical kernel row and the
    # last horizontal kernel column, so those taps are dropped entirely.
    taps_v = [(dy, dx) for dy in range(kh) for dx in range(kw)]
    taps_h = list(range(kw2))
    if mask_type == 'A':
        taps_v = [(dy, dx) for (dy, dx) in taps_v if dy != kh - 1]
        taps_h = [dx for dx in taps_h if dx != kw2 - 1]
    Kv, Kh = len(taps_v) * Cin, len(taps_h) * Cin

    # Single flattened, zero-haloed copies (no per-tap replication in HBM):
    #   x_v: top-pad pk rows, flatten rows*W, halo pk front + enough zero tail.
    #   x_h: flatten, halo pk zeros at the front (left causal pad).
    Lv = _round_up(HWp + pk * W + 2 * pk, 128)
    xvt = jnp.pad(x_v, ((0, 0), (0, 0), (pk, 0), (0, 0))).reshape(N, Cin, (H + pk) * W)
    xv_flat = jnp.pad(xvt, ((0, 0), (0, 0), (pk, Lv - pk - (H + pk) * W))).astype(bf16)
    Lh = _round_up(HWp + pk, 128)
    xh_dtype = f32 if residual else bf16     # exact residual needs f32
    xh_flat = jnp.pad(x_h.reshape(N, Cin, HW),
                      ((0, 0), (0, 0), (pk, Lh - pk - HW))).astype(xh_dtype)

    # Per-lane column index (x coordinate) for the edge masks; padding lanes give
    # garbage that is cropped in the wrapper.
    col_ids = (jnp.arange(HWp, dtype=jnp.int32) % W).reshape(1, HWp)

    # Stage-1 weights packed block-diagonally to match the tap ordering:
    # [[w_vert_taps, 0], [0, w_horiz_taps]] -> (4*dim, Kv+Kh), bf16 operands.
    wv = jnp.concatenate([params['w_vert'][:, :, dy, dx] for dy, dx in taps_v], axis=1)
    wh = jnp.concatenate([params['w_horiz'][:, :, 0, dx] for dx in taps_h], axis=1)
    w1 = jnp.zeros((4 * dim, Kv + Kh), f32)
    w1 = w1.at[:2 * dim, :Kv].set(wv).at[2 * dim:, Kv:].set(wh).astype(bf16)
    b1 = jnp.concatenate([params['b_vert'], params['b_horiz']]).reshape(4 * dim, 1).astype(f32)
    wv2h = params['w_v2h'][:, :, 0, 0].astype(bf16)            # (2*dim, 2*dim)
    bv2h = params['b_v2h'].reshape(2 * dim, 1).astype(f32)
    whr = params['w_hr'][:, :, 0, 0].astype(bf16)              # (dim, dim)
    bhr = params['b_hr'].reshape(dim, 1).astype(f32)
    hemb = params['emb'][h_labels].reshape(N, 2 * dim, 1).astype(f32)

    kernel_fn = functools.partial(
        _gated_conv_kernel, dim=dim, img_w=W, pk=pk, hwp=HWp,
        taps_v=tuple(taps_v), taps_h=tuple(taps_h), residual=residual)

    in_specs = [
        pl.BlockSpec((1, Cin, Lv), lambda n: (n, 0, 0)),          # x_v (haloed, flat)
        pl.BlockSpec((1, Cin, Lh), lambda n: (n, 0, 0)),          # x_h (haloed, flat)
        pl.BlockSpec((1, HWp), lambda n: (0, 0)),                 # column ids (resident)
        pl.BlockSpec((N, 2 * dim, 1), lambda n: (0, 0, 0)),       # class emb (resident)
        pl.BlockSpec((4 * dim, Kv + Kh), lambda n: (0, 0)),       # block-diag stage-1 W
        pl.BlockSpec((4 * dim, 1), lambda n: (0, 0)),
        pl.BlockSpec((2 * dim, 2 * dim), lambda n: (0, 0)),
        pl.BlockSpec((2 * dim, 1), lambda n: (0, 0)),
        pl.BlockSpec((dim, dim), lambda n: (0, 0)),
        pl.BlockSpec((dim, 1), lambda n: (0, 0)),
    ]
    out_specs = [
        pl.BlockSpec((1, dim, HWp), lambda n: (n, 0, 0)),
        pl.BlockSpec((1, dim, HWp), lambda n: (n, 0, 0)),
    ]

    out_v_flat, out_h_flat = pl.pallas_call(
        kernel_fn,
        out_shape=(jax.ShapeDtypeStruct((N, dim, HWp), out_dtype),
                   jax.ShapeDtypeStruct((N, dim, HWp), out_dtype)),
        grid_spec=pltpu.PrefetchScalarGridSpec(
            num_scalar_prefetch=0,
            grid=(N,),
            in_specs=in_specs,
            out_specs=out_specs),
        compiler_params=pltpu.CompilerParams(
            dimension_semantics=("parallel",)),
    )(xv_flat, xh_flat, col_ids, hemb, w1, b1, wv2h, bv2h, whr, bhr)

    # Lane-dense (N, dim, HWp) outputs: crop padding lanes, reshape straight to NCHW.
    return (out_v_flat[:, :, :HW].reshape(N, dim, H, W),
            out_h_flat[:, :, :HW].reshape(N, dim, H, W))


def _reference(x_v, x_h, h_labels, params, *, mask_type, residual, kernel):
    # pure-JAX NCHW f32 reference matching the PyTorch forward
    HIGH = jax.lax.Precision.HIGHEST
    pk = kernel // 2
    w_vert = params['w_vert']
    w_horiz = params['w_horiz']
    if mask_type == 'A':
        w_vert = w_vert.at[:, :, -1].set(0.0)
        w_horiz = w_horiz.at[:, :, :, -1].set(0.0)

    def conv(x, w, b, pad):
        y = jax.lax.conv_general_dilated(
            x, w, window_strides=(1, 1),
            padding=[(pad[0], pad[0]), (pad[1], pad[1])],
            dimension_numbers=('NCHW', 'OIHW', 'NCHW'),
            precision=HIGH)
        return y + b[None, :, None, None]

    def gate(x):
        a, b = jnp.split(x, 2, axis=1)
        return jnp.tanh(a) * jax.nn.sigmoid(b)

    h_emb = params['emb'][h_labels]
    W = x_v.shape[-1]
    H = x_h.shape[-2]
    h_vert = conv(x_v, w_vert, params['b_vert'], (pk, pk))[:, :, :W, :]
    out_v = gate(h_vert + h_emb[:, :, None, None])
    h_horiz = conv(x_h, w_horiz, params['b_horiz'], (0, pk))[:, :, :, :H]
    v2h = conv(h_vert, params['w_v2h'], params['b_v2h'], (0, 0))
    out = gate(v2h + h_horiz + h_emb[:, :, None, None])
    out_h = conv(out, params['w_hr'], params['b_hr'], (0, 0))
    if residual:
        out_h = out_h + x_h
    return out_v, out_h


if __name__ == "__main__":
    key = jax.random.PRNGKey(0)
    N, dim, H, W = 2, 8, 16, 16
    in_dim = dim            # residual add requires in_dim == dim
    kernel = 3
    n_classes = 10

    keys = jax.random.split(key, 12)
    kh, kw = kernel // 2 + 1, kernel
    kw2 = kernel // 2 + 1
    s = 0.1
    params = {
        'emb': jax.random.normal(keys[0], (n_classes, 2 * dim), jnp.float32) * s,
        'w_vert': jax.random.normal(keys[1], (2 * dim, in_dim, kh, kw), jnp.float32) * s,
        'b_vert': jax.random.normal(keys[2], (2 * dim,), jnp.float32) * s,
        'w_horiz': jax.random.normal(keys[3], (2 * dim, in_dim, 1, kw2), jnp.float32) * s,
        'b_horiz': jax.random.normal(keys[4], (2 * dim,), jnp.float32) * s,
        'w_v2h': jax.random.normal(keys[5], (2 * dim, 2 * dim, 1, 1), jnp.float32) * s,
        'b_v2h': jax.random.normal(keys[6], (2 * dim,), jnp.float32) * s,
        'w_hr': jax.random.normal(keys[7], (dim, dim, 1, 1), jnp.float32) * s,
        'b_hr': jax.random.normal(keys[8], (dim,), jnp.float32) * s,
    }
    x_v = jax.random.normal(keys[9], (N, in_dim, H, W), jnp.float32)
    x_h = jax.random.normal(keys[10], (N, in_dim, H, W), jnp.float32)
    h_labels = jax.random.randint(keys[11], (N,), 0, n_classes)

    # Exercise both causal (mask A) and non-causal (mask B) paths.
    for mask_type, residual in (('A', True), ('B', False)):
        out_v, out_h = gated_masked_conv2d(
            x_v, x_h, h_labels, params,
            mask_type=mask_type, residual=residual, kernel=kernel)
        out_v, out_h = jax.block_until_ready((out_v, out_h))

        ref_v, ref_h = _reference(x_v, x_h, h_labels, params, mask_type=mask_type,
                                  residual=residual, kernel=kernel)
        # bf16 matmul operands (f32 accumulate) vs f32-HIGHEST reference -> 2e-2 tol.
        np.testing.assert_allclose(np.asarray(out_v), np.asarray(ref_v),
                                   rtol=2e-2, atol=2e-2)
        np.testing.assert_allclose(np.asarray(out_h), np.asarray(ref_h),
                                   rtol=2e-2, atol=2e-2)

    print("KERNEL_OK")
</pallas_src>

<mosaic_0001>
module attributes {stable_mosaic.version = 11 : i64} {
  func.func @_gated_conv_kernel(%arg0: i32, %arg1: memref<1x8x384xbf16, #tpu.memory_space<vmem>>, %arg2: memref<1x8x384xf32, #tpu.memory_space<vmem>>, %arg3: memref<1x256xi32, #tpu.memory_space<vmem>>, %arg4: memref<2x16x1xf32, #tpu.memory_space<vmem>>, %arg5: memref<32x32xbf16, #tpu.memory_space<vmem>>, %arg6: memref<32x1xf32, #tpu.memory_space<vmem>>, %arg7: memref<16x16xbf16, #tpu.memory_space<vmem>>, %arg8: memref<16x1xf32, #tpu.memory_space<vmem>>, %arg9: memref<8x8xbf16, #tpu.memory_space<vmem>>, %arg10: memref<8x1xf32, #tpu.memory_space<vmem>>, %arg11: memref<1x8x256xf32, #tpu.memory_space<vmem>>, %arg12: memref<1x8x256xf32, #tpu.memory_space<vmem>>) attributes {dimension_semantics = [#tpu.dimension_semantics<parallel>], iteration_bounds = array<i64: 2>, scalar_prefetch = 0 : i64, scratch_operands = 0 : i64, tpu.core_type = #tpu.core_type<tc>, window_params = [{transform_indices = @transform_0, window_bounds = array<i64: 1, 8, 384>}, {transform_indices = @transform_1, window_bounds = array<i64: 1, 8, 384>}, {pipeline_mode = #tpu.pipeline_mode<synchronous>, transform_indices = @transform_2, window_bounds = array<i64: 1, 256>}, {pipeline_mode = #tpu.pipeline_mode<synchronous>, transform_indices = @transform_3, window_bounds = array<i64: 2, 16, 1>}, {pipeline_mode = #tpu.pipeline_mode<synchronous>, transform_indices = @transform_4, window_bounds = array<i64: 32, 32>}, {pipeline_mode = #tpu.pipeline_mode<synchronous>, transform_indices = @transform_5, window_bounds = array<i64: 32, 1>}, {pipeline_mode = #tpu.pipeline_mode<synchronous>, transform_indices = @transform_6, window_bounds = array<i64: 16, 16>}, {pipeline_mode = #tpu.pipeline_mode<synchronous>, transform_indices = @transform_7, window_bounds = array<i64: 16, 1>}, {pipeline_mode = #tpu.pipeline_mode<synchronous>, transform_indices = @transform_8, window_bounds = array<i64: 8, 8>}, {pipeline_mode = #tpu.pipeline_mode<synchronous>, transform_indices = @transform_9, window_bounds = array<i64: 8, 1>}, {transform_indices = @transform_10, window_bounds = array<i64: 1, 8, 256>}, {transform_indices = @transform_11, window_bounds = array<i64: 1, 8, 256>}]} {
    %c0 = arith.constant 0 : index
    %c0_0 = arith.constant 0 : index
    %0 = vector.load %arg3[%c0, %c0_0] : memref<1x256xi32, #tpu.memory_space<vmem>>, vector<1x256xi32>
    %c0_1 = arith.constant 0 : index
    %c0_2 = arith.constant 0 : index
    %c0_3 = arith.constant 0 : index
    %1 = vector.load %arg1[%c0_1, %c0_2, %c0_3] : memref<1x8x384xbf16, #tpu.memory_space<vmem>>, vector<1x8x384xbf16>
    %2 = vector.shape_cast %1 : vector<1x8x384xbf16> to vector<8x384xbf16>
    %c0_4 = arith.constant 0 : index
    %c0_5 = arith.constant 0 : index
    %c0_6 = arith.constant 0 : index
    %3 = vector.load %arg2[%c0_4, %c0_5, %c0_6] : memref<1x8x384xf32, #tpu.memory_space<vmem>>, vector<1x8x384xf32>
    %4 = vector.shape_cast %3 : vector<1x8x384xf32> to vector<8x384xf32>
    %5 = arith.truncf %4 : vector<8x384xf32> to vector<8x384xbf16>
    %6 = vector.extract_strided_slice %2 {offsets = [0, 0], sizes = [8, 256], strides = [1, 1]} : vector<8x384xbf16> to vector<8x256xbf16>
    %c1_i32 = arith.constant 1 : i32
    %7 = vector.broadcast %c1_i32 : i32 to vector<1x256xi32>
    %8 = arith.cmpi sge, %0, %7 : vector<1x256xi32>
    %cst = arith.constant 0.000000e+00 : bf16
    %9 = vector.broadcast %cst : bf16 to vector<8x256xbf16>
    %10 = vector.shape_cast %8 : vector<1x256xi1> to vector<1x256xi1>
    %11 = vector.broadcast %10 : vector<1x256xi1> to vector<8x256xi1>
    %12 = arith.select %11, %6, %9 : vector<8x256xi1>, vector<8x256xbf16>
    %13 = vector.extract_strided_slice %2 {offsets = [0, 1], sizes = [8, 256], strides = [1, 1]} : vector<8x384xbf16> to vector<8x256xbf16>
    %14 = vector.extract_strided_slice %2 {offsets = [0, 2], sizes = [8, 256], strides = [1, 1]} : vector<8x384xbf16> to vector<8x256xbf16>
    %c15_i32 = arith.constant 15 : i32
    %15 = vector.broadcast %c15_i32 : i32 to vector<1x256xi32>
    %16 = arith.cmpi slt, %0, %15 : vector<1x256xi32>
    %cst_7 = arith.constant 0.000000e+00 : bf16
    %17 = vector.broadcast %cst_7 : bf16 to vector<8x256xbf16>
    %18 = vector.shape_cast %16 : vector<1x256xi1> to vector<1x256xi1>
    %19 = vector.broadcast %18 : vector<1x256xi1> to vector<8x256xi1>
    %20 = arith.select %19, %14, %17 : vector<8x256xi1>, vector<8x256xbf16>
    %21 = vector.extract_strided_slice %5 {offsets = [0, 0], sizes = [8, 256], strides = [1, 1]} : vector<8x384xbf16> to vector<8x256xbf16>
    %c1_i32_8 = arith.constant 1 : i32
    %22 = vector.broadcast %c1_i32_8 : i32 to vector<1x256xi32>
    %23 = arith.cmpi sge, %0, %22 : vector<1x256xi32>
    %cst_9 = arith.constant 0.000000e+00 : bf16
    %24 = vector.broadcast %cst_9 : bf16 to vector<8x256xbf16>
    %25 = vector.shape_cast %23 : vector<1x256xi1> to vector<1x256xi1>
    %26 = vector.broadcast %25 : vector<1x256xi1> to vector<8x256xi1>
    %27 = arith.select %26, %21, %24 : vector<8x256xi1>, vector<8x256xbf16>
    %28 = tpu.concatenate %12, %13, %20, %27 in 0 : vector<8x256xbf16>, vector<8x256xbf16>, vector<8x256xbf16>, vector<8x256xbf16> -> vector<32x256xbf16>
    %c0_10 = arith.constant 0 : index
    %c0_11 = arith.constant 0 : index
    %29 = vector.load %arg5[%c0_10, %c0_11] : memref<32x32xbf16, #tpu.memory_space<vmem>>, vector<32x32xbf16>
    %cst_12 = arith.constant dense<0.000000e+00> : vector<32x256xf32>
    %30 = tpu.matmul %29, %28, %cst_12 {dimension_numbers = #tpu.dot_dimension_numbers<[1], [0], [0], [1], [0, 0, 1, 1], [], []>} : vector<32x32xbf16>, vector<32x256xbf16>, vector<32x256xf32> -> vector<32x256xf32>
    %c0_13 = arith.constant 0 : index
    %c0_14 = arith.constant 0 : index
    %31 = vector.load %arg6[%c0_13, %c0_14] : memref<32x1xf32, #tpu.memory_space<vmem>>, vector<32x1xf32>
    %32 = vector.broadcast %31 : vector<32x1xf32> to vector<32x256xf32>
    %33 = arith.addf %30, %32 : vector<32x256xf32>
    %34 = vector.extract_strided_slice %33 {offsets = [0, 0], sizes = [16, 256], strides = [1, 1]} : vector<32x256xf32> to vector<16x256xf32>
    %35 = vector.extract_strided_slice %33 {offsets = [16, 0], sizes = [16, 256], strides = [1, 1]} : vector<32x256xf32> to vector<16x256xf32>
    %36 = arith.index_cast %arg0 : i32 to index
    %c0_15 = arith.constant 0 : index
    %c0_16 = arith.constant 0 : index
    %37 = vector.load %arg4[%36, %c0_15, %c0_16] : memref<2x16x1xf32, #tpu.memory_space<vmem>>, vector<1x16x1xf32>
    %38 = vector.shape_cast %37 : vector<1x16x1xf32> to vector<16x1xf32>
    %39 = vector.broadcast %38 : vector<16x1xf32> to vector<16x256xf32>
    %40 = arith.addf %34, %39 : vector<16x256xf32>
    %41 = vector.extract_strided_slice %40 {offsets = [0, 0], sizes = [8, 256], strides = [1, 1]} : vector<16x256xf32> to vector<8x256xf32>
    %42 = math.tanh %41 : vector<8x256xf32>
    %43 = vector.extract_strided_slice %40 {offsets = [8, 0], sizes = [8, 256], strides = [1, 1]} : vector<16x256xf32> to vector<8x256xf32>
    %cst_17 = arith.constant 5.000000e-01 : f32
    %44 = vector.broadcast %cst_17 : f32 to vector<8x256xf32>
    %45 = arith.mulf %44, %43 : vector<8x256xf32>
    %46 = math.tanh %45 : vector<8x256xf32>
    %cst_18 = arith.constant 5.000000e-01 : f32
    %47 = vector.broadcast %cst_18 : f32 to vector<8x256xf32>
    %48 = arith.mulf %47, %46 : vector<8x256xf32>
    %cst_19 = arith.constant 5.000000e-01 : f32
    %49 = vector.broadcast %cst_19 : f32 to vector<8x256xf32>
    %50 = arith.addf %48, %49 : vector<8x256xf32>
    %51 = arith.mulf %42, %50 : vector<8x256xf32>
    %c0_20 = arith.constant 0 : index
    %c0_21 = arith.constant 0 : index
    %c0_22 = arith.constant 0 : index
    %52 = vector.load %arg11[%c0_20, %c0_21, %c0_22] : memref<1x8x256xf32, #tpu.memory_space<vmem>>, vector<1x8x256xf32>
    %53 = vector.shape_cast %52 : vector<1x8x256xf32> to vector<8x256xf32>
    %54 = vector.shape_cast %51 : vector<8x256xf32> to vector<1x8x256xf32>
    tpu.vector_store %arg11[%c0_20, %c0_21, %c0_22], %54 {strides = array<i32>} : memref<1x8x256xf32, #tpu.memory_space<vmem>>, vector<1x8x256xf32>,
    %c0_23 = arith.constant 0 : index
    %c0_24 = arith.constant 0 : index
    %55 = vector.load %arg7[%c0_23, %c0_24] : memref<16x16xbf16, #tpu.memory_space<vmem>>, vector<16x16xbf16>
    %56 = arith.truncf %34 : vector<16x256xf32> to vector<16x256xbf16>
    %cst_25 = arith.constant dense<0.000000e+00> : vector<16x256xf32>
    %57 = tpu.matmul %55, %56, %cst_25 {dimension_numbers = #tpu.dot_dimension_numbers<[1], [0], [0], [1], [0, 0, 1, 1], [], []>} : vector<16x16xbf16>, vector<16x256xbf16>, vector<16x256xf32> -> vector<16x256xf32>
    %c0_26 = arith.constant 0 : index
    %c0_27 = arith.constant 0 : index
    %58 = vector.load %arg8[%c0_26, %c0_27] : memref<16x1xf32, #tpu.memory_space<vmem>>, vector<16x1xf32>
    %59 = vector.broadcast %58 : vector<16x1xf32> to vector<16x256xf32>
    %60 = arith.addf %57, %59 : vector<16x256xf32>
    %61 = arith.addf %60, %35 : vector<16x256xf32>
    %62 = vector.broadcast %38 : vector<16x1xf32> to vector<16x256xf32>
    %63 = arith.addf %61, %62 : vector<16x256xf32>
    %64 = vector.extract_strided_slice %63 {offsets = [0, 0], sizes = [8, 256], strides = [1, 1]} : vector<16x256xf32> to vector<8x256xf32>
    %65 = math.tanh %64 : vector<8x256xf32>
    %66 = vector.extract_strided_slice %63 {offsets = [8, 0], sizes = [8, 256], strides = [1, 1]} : vector<16x256xf32> to vector<8x256xf32>
    %cst_28 = arith.constant 5.000000e-01 : f32
    %67 = vector.broadcast %cst_28 : f32 to vector<8x256xf32>
    %68 = arith.mulf %67, %66 : vector<8x256xf32>
    %69 = math.tanh %68 : vector<8x256xf32>
    %cst_29 = arith.constant 5.000000e-01 : f32
    %70 = vector.broadcast %cst_29 : f32 to vector<8x256xf32>
    %71 = arith.mulf %70, %69 : vector<8x256xf32>
    %cst_30 = arith.constant 5.000000e-01 : f32
    %72 = vector.broadcast %cst_30 : f32 to vector<8x256xf32>
    %73 = arith.addf %71, %72 : vector<8x256xf32>
    %74 = arith.mulf %65, %73 : vector<8x256xf32>
    %c0_31 = arith.constant 0 : index
    %c0_32 = arith.constant 0 : index
    %75 = vector.load %arg9[%c0_31, %c0_32] : memref<8x8xbf16, #tpu.memory_space<vmem>>, vector<8x8xbf16>
    %76 = arith.truncf %74 : vector<8x256xf32> to vector<8x256xbf16>
    %cst_33 = arith.constant dense<0.000000e+00> : vector<8x256xf32>
    %77 = tpu.matmul %75, %76, %cst_33 {dimension_numbers = #tpu.dot_dimension_numbers<[1], [0], [0], [1], [0, 0, 1, 1], [], []>} : vector<8x8xbf16>, vector<8x256xbf16>, vector<8x256xf32> -> vector<8x256xf32>
    %c0_34 = arith.constant 0 : index
    %c0_35 = arith.constant 0 : index
    %78 = vector.load %arg10[%c0_34, %c0_35] : memref<8x1xf32, #tpu.memory_space<vmem>>, vector<8x1xf32>
    %79 = vector.broadcast %78 : vector<8x1xf32> to vector<8x256xf32>
    %80 = arith.addf %77, %79 : vector<8x256xf32>
    %81 = vector.extract_strided_slice %4 {offsets = [0, 1], sizes = [8, 256], strides = [1, 1]} : vector<8x384xf32> to vector<8x256xf32>
    %82 = arith.addf %80, %81 : vector<8x256xf32>
    %c0_36 = arith.constant 0 : index
    %c0_37 = arith.constant 0 : index
    %c0_38 = arith.constant 0 : index
    %83 = vector.load %arg12[%c0_36, %c0_37, %c0_38] : memref<1x8x256xf32, #tpu.memory_space<vmem>>, vector<1x8x256xf32>
    %84 = vector.shape_cast %83 : vector<1x8x256xf32> to vector<8x256xf32>
    %85 = vector.shape_cast %82 : vector<8x256xf32> to vector<1x8x256xf32>
    tpu.vector_store %arg12[%c0_36, %c0_37, %c0_38], %85 {strides = array<i32>} : memref<1x8x256xf32, #tpu.memory_space<vmem>>, vector<1x8x256xf32>,
    return
  }
  func.func @transform_0(%arg0: i32) -> (i32, i32, i32) {
    %c0_i32 = arith.constant 0 : i32
    %c0_i32_0 = arith.constant 0 : i32
    %c0_i32_1 = arith.constant 0 : i32
    return %arg0, %c0_i32, %c0_i32_0 : i32, i32, i32
  }
  func.func @transform_1(%arg0: i32) -> (i32, i32, i32) {
    %c0_i32 = arith.constant 0 : i32
    %c0_i32_0 = arith.constant 0 : i32
    %c0_i32_1 = arith.constant 0 : i32
    return %arg0, %c0_i32, %c0_i32_0 : i32, i32, i32
  }
  func.func @transform_2(%arg0: i32) -> (i32, i32) {
    %c0_i32 = arith.constant 0 : i32
    %c0_i32_0 = arith.constant 0 : i32
    %c0_i32_1 = arith.constant 0 : i32
    return %c0_i32, %c0_i32_0 : i32, i32
  }
  func.func @transform_3(%arg0: i32) -> (i32, i32, i32) {
    %c0_i32 = arith.constant 0 : i32
    %c0_i32_0 = arith.constant 0 : i32
    %c0_i32_1 = arith.constant 0 : i32
    %c0_i32_2 = arith.constant 0 : i32
    return %c0_i32, %c0_i32_0, %c0_i32_1 : i32, i32, i32
  }
  func.func @transform_4(%arg0: i32) -> (i32, i32) {
    %c0_i32 = arith.constant 0 : i32
    %c0_i32_0 = arith.constant 0 : i32
    %c0_i32_1 = arith.constant 0 : i32
    return %c0_i32, %c0_i32_0 : i32, i32
  }
  func.func @transform_5(%arg0: i32) -> (i32, i32) {
    %c0_i32 = arith.constant 0 : i32
    %c0_i32_0 = arith.constant 0 : i32
    %c0_i32_1 = arith.constant 0 : i32
    return %c0_i32, %c0_i32_0 : i32, i32
  }
  func.func @transform_6(%arg0: i32) -> (i32, i32) {
    %c0_i32 = arith.constant 0 : i32
    %c0_i32_0 = arith.constant 0 : i32
    %c0_i32_1 = arith.constant 0 : i32
    return %c0_i32, %c0_i32_0 : i32, i32
  }
  func.func @transform_7(%arg0: i32) -> (i32, i32) {
    %c0_i32 = arith.constant 0 : i32
    %c0_i32_0 = arith.constant 0 : i32
    %c0_i32_1 = arith.constant 0 : i32
    return %c0_i32, %c0_i32_0 : i32, i32
  }
  func.func @transform_8(%arg0: i32) -> (i32, i32) {
    %c0_i32 = arith.constant 0 : i32
    %c0_i32_0 = arith.constant 0 : i32
    %c0_i32_1 = arith.constant 0 : i32
    return %c0_i32, %c0_i32_0 : i32, i32
  }
  func.func @transform_9(%arg0: i32) -> (i32, i32) {
    %c0_i32 = arith.constant 0 : i32
    %c0_i32_0 = arith.constant 0 : i32
    %c0_i32_1 = arith.constant 0 : i32
    return %c0_i32, %c0_i32_0 : i32, i32
  }
  func.func @transform_10(%arg0: i32) -> (i32, i32, i32) {
    %c0_i32 = arith.constant 0 : i32
    %c0_i32_0 = arith.constant 0 : i32
    %c0_i32_1 = arith.constant 0 : i32
    return %arg0, %c0_i32, %c0_i32_0 : i32, i32, i32
  }
  func.func @transform_11(%arg0: i32) -> (i32, i32, i32) {
    %c0_i32 = arith.constant 0 : i32
    %c0_i32_0 = arith.constant 0 : i32
    %c0_i32_1 = arith.constant 0 : i32
    return %arg0, %c0_i32, %c0_i32_0 : i32, i32, i32
  }
}

</mosaic_0001>

<bundles_post_ra>
// kernel: tpu_custom_call.1
= control target key start
LH: loop header
LB: loop body
LE: loop exit
PB: predicated region body
PF: predicated region fallthrough
CT: control target
= control target key end

     0   :  { %s1604_s0 = inlined_call_operand.vmem [shape: bf16[2,8,384], index: 0, kind: input, shape index: {}]   ;;  %s1605_s1 = inlined_call_operand.vmem [shape: f32[2,8,384], index: 1, kind: input, shape index: {}]   ;;  %s1606_s2 = inlined_call_operand.hbm [shape: s32[1,256], index: 2, kind: input, shape index: {}]   ;;  %s1607_s3 = inlined_call_operand.vmem [shape: f32[2,16,1], index: 3, kind: input, shape index: {}]   ;;  %s1608_s4 = inlined_call_operand.vmem [shape: bf16[32,32], index: 4, kind: input, shape index: {}]   ;;  %s1609_s5 = inlined_call_operand.vmem [shape: f32[32,1], index: 5, kind: input, shape index: {}]   ;;  %s1610_s6 = inlined_call_operand.vmem [shape: bf16[16,16], index: 6, kind: input, shape index: {}]   ;;  %s1611_s7 = inlined_call_operand.vmem [shape: f32[16,1], index: 7, kind: input, shape index: {}]   ;;  %s1612_s8 = inlined_call_operand.vmem [shape: bf16[8,8], index: 8, kind: input, shape index: {}]   ;;  %s1613_s9 = inlined_call_operand.vmem [shape: f32[8,1], index: 9, kind: input, shape index: {}]   ;;  %s1614_s10 = inlined_call_operand.hbm [shape: f32[2,8,256], index: 10, kind: output, shape index: {0}]   ;;  %s1615_s11 = inlined_call_operand.hbm [shape: f32[2,8,256], index: 11, kind: output, shape index: {1}]  }
   0x1   :  { %1623 = sst [smem:[#allocation12_spill]] %s1604_s0 }
   0x2   :  { %17 = vsyncpa [#allocation3], 0 }
   0x3   :  { %18 = vsyncpa [#allocation4], 0 }
   0x4   :  { %20 = vsyncpa [#allocation4 + $0x1], 0 }
   0x5   :  { %21 = vsyncpa [#allocation7], 0 }
   0x6   :  { %23 = vsyncpa [#allocation7 + $0x1], 0  ;;  %s1330_s17 = smov 0   ;;  %s1332_s18 = smov 0  }
   0x7   :  { %s1334_s19 = smov 0   ;;  %s1336_s20 = smov 0  }
   0x8 LB: > { %s1351_s21 = sadd.s32 4294967295, %s1261_s20   ;;  %s997_s22 = sadd.s32 4294967294, %s1261_s20   ;;  %s1261_s20 = sphi %s1336_s20, %s1644_s20   ;;  %s1257_s19 = sphi %s1334_s19, %s1643_s19   ;;  %s1253_s18 = sphi %s1332_s18, %s1642_s18   ;;  %s1249_s17 = sphi %s1330_s17, %s1641_s17  }
   0x9   : > { %s1355_s23 = sadd.s32 1, %s1261_s20   ;;  %s256_s24 = sadd.s32 1, %s1257_s19 }
   0xa   : > { %s253_s25 = ssub.s32 %s1261_s20, %s1355_s23  ;;  %p266_p0 = scmp.ne.s32.totalorder %s1257_s19, %s1253_s18 }
   0xb   : > { %p254_p1 = scmp.eq.s32.totalorder %s253_s25, 0  ;;  %p267_p2 = scmp.eq.s32.totalorder %s1351_s21, 1 }
   0xc   : > { %p272_p3 = scmp.ne.s32.totalorder %s1253_s18, %s1249_s17  ;;  %p273_p4 = scmp.eq.s32.totalorder %s997_s22, 1 }
   0xd   : > { %s1366_s26 = scalar_select %p254_p1, %s1257_s19, %s256_s24  }
   0xe   : > { %p1368_p5 = por %p267_p2, %p266_p0  ;;  %p1372_p6 = por %p273_p4, %p272_p3 }
   0xf   : > { %1624 = sst [smem:[#allocation11_spill]] %s1366_s26  ;;  %p998_p7 = scmp.ge.s32.totalorder %s1261_s20, 1 }
  0x10   : > { %s1625_s27 = scalar_select %p1368_p5, 1, 0 }
  0x11   : > { %s1626_s28 = scalar_select %p1372_p6, 1, 0 }
  0x12   : > { %p306_p8 = scmp.lt.s32.totalorder %s1261_s20, 3  ;;  %p1616_p9 = scmp.eq.s32.totalorder %s1351_s21, 0 }
  0x13   : > { %s1263_s30 = smov [#allocation2]   ;;  %s1135_s16 = scalar_lea.hbm %s1606_s2, 32 }
  0x14   : > { %p1379_p10 = pnand %p998_p7, %p306_p8  ;;  %s319_s12 = sshll.u32 %s1263_s30, 4  ;;  %s320_s12 = int_to_ptr.vmem [resolvable:$true] %s319_s12 }
  0x15   : > { %p1136_p13 = scmp.ne.s32.totalorder %s1606_s2, %s1135_s16  ;;  %p1142_p3 = scmp.lt.u32.totalorder %s1135_s16, %s1606_s2 }
  0x16   : > { %s1627_s29 = scalar_select %p1379_p10, 1, 0 }
  0x17   : > { %p1060_p11 = pneg %p1379_p10 }
  0x19   : > { %p1387_p12 = pnand %p1616_p9, %p1060_p11 }
  0x1b   : > { %p1137_p0 = pneg %p1387_p12 }
  0x1d   : > { %p1138_p1 = pnand %p1137_p0, %p1136_p13 }
  0x1f   : > { %p1139_p2 = pneg %p1138_p1 }
  0x21   : > { %p1144_p4 = pnand %p1142_p3, %p1139_p2 }
  0x23   : > { %1147 = shalt.err (!%p1144_p4)
}
  0x24   : > { %s1148_s26 = scalar_lea.vmem %s320_s12, 32  ;;  %p1156_p9 = scmp.lt.s32.totalorder %s320_s12, %s320_s12 }
  0x25   : > { %p1149_p7 = scmp.ne.s32.totalorder %s320_s12, %s1148_s26  ;;  %p1157_p6 = scmp.lt.s32.totalorder %s1148_s26, %s1148_s26 }
  0x27   : > { %p1151_p8 = pnand %p1149_p7, %p1137_p0  ;;  %p1158_p5 = por %p1157_p6, %p1156_p9 }
  0x29   : > { %p1152_p11 = pneg %p1151_p8 }
  0x2b   : > { %p1159_p10 = pnand %p1158_p5, %p1152_p11 }
  0x2d   : > { %1162 = shalt.err (!%p1159_p10)
}
  0x2e   : > { %1063 = dma.hbm_to_vmem [thread:$0]  (!%p1387_p12), %s1606_s2, 32, %s320_s12, [#allocation3]  }
  0x2f   : > { %p1629_p13 = scmp.ne.s32.totalorder %s1627_s29, 0 }
  0x30   : > { %p1630_p1 = scmp.eq.s32.totalorder (!%p1629_p13), %s1351_s21, 0 }
  0x31   : > { %369 = sbr.rel (%p1629_p13) target bundleno = 1012 (0x3f4), region = 60 }
  0x38   : > { %1236 = dma.done.wait (%p1630_p1), [#allocation3], 32   ;;  %p1631_p0 = pmov %p1630_p1 }
  0x39   : > { %v442_v0 = vlaneseq  ;;  %p419_p5 = scmp.lt.s32.totalorder %s1351_s21, 1  ;;  %v1264_v1 = vmov 0   ;;  %s1632_s0 = sld [smem:[#allocation12_spill]]  ;;  %v432_v5 = vld [vmem:[#allocation2] sm:$0x3]  ;;  %vm471_vm10 = vcmask 15360  }
  0x3a   : > { %1238 = vsyncadd (%p1631_p0), [#allocation3], 4294967264  ;;  %627 = vmatprep.mubr.bf16.mxu0 %v1264_v1  ;;  %637 = vmatprep.mubr.bf16.mxu1 %v1264_v1  ;;  %vm454_vm0 = vcmp.lt.s32.totalorder %v432_v5, 15  ;;  %vm440_vm1 = vcmp.ge.s32.totalorder %v432_v5, 1  ;;  %s1619_s22 = smov 127   ;;  %s1266_s24 = smov 2  }
  0x3b   : > { %v443_v2 = vshrl.u32 %v442_v0, 7  ;;  %s1417_s26 = scalar_select %p419_p5, %s1351_s21, 1  ;;  %1111 = vset.pattern.permute.xlu1 %v1264_v1  ;;  %1112 = vset.pattern.permute.xlu0 %v1264_v1  ;;  %v455_v9 = vsel %vm454_vm0, 1, %v1264_v1  ;;  %v441_v10 = vsel %vm440_vm1, 1, %v1264_v1  ;;  %vm509_vm11 = vcmask 1039360   ;;  %v554_v46 = vld [vmem:[%s1609_s5] sm:$0xff] }
  0x3c   : > { %vm533_vm13 = vcmask 1043456   ;;  %v557_v48 = vld [vmem:[%s1609_s5 + $0x18] sm:$0xff]  ;;  %v555_v49 = vld [vmem:[%s1609_s5 + $0x8] sm:$0xff]  ;;  %s1019_s30 = sshll.u32 %s1351_s21, 4  ;;  %v556_v51 = vld [vmem:[%s1609_s5 + $0x10] sm:$0xff]  ;;  %s1635_s14 = smov 127  }
  0x3d   : > { %s1050_s29 = smul.u32 12, %s1417_s26  ;;  %v444_v3 = vsub.s32 0, %v443_v2  ;;  %v448_v4 = vsub.s32 1, %v443_v2  ;;  %v484_v20 = vsub.s32 4, %v443_v2  ;;  %v685_v50 = vld [vmem:[%s1611_s7 + $0x8] sm:$0xff]  ;;  %s649_s13 = scalar_lea.vmem %s1607_s3, %s1019_s30  ;;  %v684_v53 = vld [vmem:[%s1611_s7] sm:$0xff] }
  0x3e   : > { %s1051_s25 = smul.u32 24, %s1417_s26  ;;  %s1267_s26 = smov 126   ;;  %v651_v52 = vld [vmem:[%s649_s13 + $0x8] sm:$0xff]  ;;  %v650_v54 = vld [vmem:[%s649_s13] sm:$0xff]  ;;  %vm526_vm15 = vcmask 1031168   ;;  %vm588_vm0 = vcmask 261120  }
  0x3f   : > { %s423_s16 = scalar_lea.vmem %s1632_s0, %s1050_s29  ;;  %v459_v11 = vrot.slane %v455_v9, %v444_v3  ;;  %v463_v12 = vrot.slane %v455_v9, %v448_v4  ;;  %v449_v13 = vrot.slane %v441_v10, %v448_v4  ;;  %v445_v15 = vrot.slane %v441_v10, %v444_v3  ;;  %v771_v55 = vld [vmem:[%s1613_s9] sm:$0xff]  ;;  %p1636_p9 = scmp.ne.s32.totalorder %s1625_s27, 0 }
  0x40   : > { %v434_v6 = vld [vmem:[%s423_s16 + $0x8] sm:$0xf]  ;;  %v433_v7 = vld [vmem:[%s423_s16] sm:$0xff]  ;;  %s1439_s15 = scalar_lea.vmem %s1605_s1, %s1051_s25  ;;  %vm701_vm1 = vcmask 130048   ;;  %s1505_s16 = sand.u32 1, %s1253_s18  }
  0x41   : > { %v1011_v8 = vcombine.low %v434_v6, %v434_v6  ;;  %v1009_v14 = vcombine.low %v433_v7, %v433_v7  ;;  %vm464_vm2 = vcmp.eq.s32.totalorder %v459_v11, 1  ;;  %vm465_vm3 = vcmp.eq.s32.totalorder %v463_v12, 1  ;;  %v436_v21 = vld [vmem:[%s1439_s15 + $0x8] sm:$0xff]  ;;  %v435_v25 = vld [vmem:[%s1439_s15] sm:$0xff] }
  0x42   : > { %vm466_vm4 = vmpackc.low %vm465_vm3, %vm464_vm2  ;;  %vm451_vm5 = vcmp.eq.s32.totalorder %v449_v13, 1  ;;  %v1010_v17 = vcombine.high %v433_v7, %v433_v7  ;;  %vm450_vm6 = vcmp.eq.s32.totalorder %v445_v15, 1  ;;  %v439_v23 = vpack.c.bf16 %v436_v21, %v436_v21  ;;  %v1116_v2 = vld [vmem:[%s1608_s4] sm:$0xff]  }
  0x43   : > { %507 = vrot.lane.b32.xlu1 %v1011_v8, %s1619_s22  ;;  %v467_v16 = vsel %vm466_vm4, 65537, %v1264_v1  ;;  %vm1430_vm7 = vmpackc.low %vm451_vm5, %vm450_vm6  ;;  %v438_v27 = vpack.c.bf16 %v435_v25, %v435_v25  ;;  %vm777_vm2 = vcmask 64512  }
  0x44   : > { %468 = vrot.lane.b32.xlu0 %v467_v16, %s1266_s24  ;;  %v477_v19 = vsel %vm1430_vm7, 65537, %v1264_v1  ;;  %v453_v30 = vsel %vm1430_vm7, %v433_v7, 0  ;;  %s1621_s24 = sshll.u32 %s1505_s16, 4 }
  0x45   : > { %v485_v22 = vrot.slane %v477_v19, %v484_v20  ;;  %v481_v26 = vrot.slane %v477_v19, %v444_v3  ;;  %v1008_v34 = vcombine.high %v453_v30, %v453_v30  ;;  %v1007_v35 = vcombine.low %v453_v30, %v453_v30  ;;  %v1117_v3 = vld [vmem:[%s1608_s4 + $0x8] sm:$0xff]  }
  0x47   : > { %503 = vrot.lane.b32.xlu1 %v1009_v14, %s1619_s22  ;;  %vm487_vm8 = vcmp.ne.s16.totalorder %v485_v22, 0  ;;  %vm486_vm9 = vcmp.ne.s16.totalorder %v481_v26, 0 }
  0x48   : > { %505 = vrot.lane.b32.xlu0 %v1010_v17, %s1619_s22  ;;  %v1445_v24 = vsel %vm487_vm8, %v439_v23, 0  ;;  %v1448_v29 = vsel %vm486_vm9, %v438_v27, 0  ;;  %v1118_v27 = vld [vmem:[%s1610_s6] sm:$0xff]   ;;  %s1510_s22 = scalar_lea.vmem [#allocation5], %s1621_s24  ;;  %s1268_s24 = smov [#allocation5]  }
  0x49   : > { %v532_v56 = vrot.slane %v1445_v24, 4  ;;  %v531_v61 = vrot.slane %v1448_v29, 4  ;;  %s866_s0 = sshll.u32 %s1510_s22, 4  ;;  %s867_s0 = int_to_ptr.vmem [resolvable:$true] %s866_s0 }
  0x4a   : > { %s1163_s13 = scalar_lea.vmem %s867_s0, 256 }
  0x4b   : > { %p1164_p6 = scmp.ne.s32.totalorder %s867_s0, %s1163_s13 }
  0x4d   : > { %p1165_p10 = pnand %p1164_p6, %p1636_p9 }
  0x4f   : > { %p1166_p12 = pneg %p1165_p10 }
  0xb5   : > { %v508_v28 = vpop.permute.xlu1 %507 }
  0xb6   : > { %v469_v31 = vpop.permute.xlu0 %468 }
  0xb7   : > { %v470_v32 = vrot.slane %v469_v31, 4 }
  0xb9   : > { %v504_v33 = vpop.permute.xlu1 %503  ;;  %v472_v36 = vsel %vm471_vm10, %v470_v32, %v469_v31  ;;  %vm474_vm12 = vcmp.ne.s16.totalorder %v470_v32, 0 }
  0xba   : > { %vm473_vm14 = vcmp.ne.s16.totalorder %v472_v36, 0  ;;  %v476_v37 = vsel %vm474_vm12, %v434_v6, 0  ;;  %v506_v38 = vpop.permute.xlu0 %505 }
  0xbb   : > { %v475_v39 = vsel %vm473_vm14, %v433_v7, 0  ;;  %v1014_v40 = vcombine.low %v476_v37, %v476_v37  ;;  %v510_v41 = vsel %vm509_vm11, %v504_v33, %v506_v38  ;;  %v511_v42 = vsel %vm509_vm11, %v506_v38, %v508_v28 }
  0xbc   : > { %v1013_v43 = vcombine.high %v475_v39, %v475_v39  ;;  %v540_v44 = vsel %vm533_vm13, %v1008_v34, %v511_v42  ;;  %v536_v45 = vsel %vm533_vm13, %v1007_v35, %v510_v41  ;;  %v1012_v47 = vcombine.low %v475_v39, %v475_v39 }
  0xbd   : > { %524 = vrot.lane.b32.xlu1 %v1014_v40, %s1267_s26  ;;  %595 = vmatprep.subr.bf16.mxu0 %v540_v44  ;;  %v437_v40 = vld [vmem:[%s1439_s15 + $0x10] sm:$0xff]  ;;  %s1167_s15 = sshll.u32 %s1268_s24, 4  ;;  %s1168_s15 = int_to_ptr.vmem [resolvable:$false] %s1167_s15 }
  0xbe   : > { %522 = vrot.lane.b32.xlu0 %v1013_v43, %s1267_s26  ;;  %1034 = vmatprep.subr.bf16.mxu1 %v540_v44  ;;  %s1169_s25 = scalar_lea.vmem %s1168_s15, 512  ;;  %p1170_p2 = scmp.lt.s32.totalorder %s867_s0, %s1168_s15 }
  0xbf   : > { %596 = vmatpush1.bf16.msra.mxu0 %v536_v45  ;;  %1036 = vmatpush1.bf16.msra.mxu1 %v536_v45  ;;  %p1171_p3 = scmp.lt.s32.totalorder %s1169_s25, %s1163_s13 }
  0xc1   : > { %560 = vperm.xlu1 %1111, %v554_v46   ;;  %p1172_p4 = por %p1171_p3, %p1170_p2 }
  0xc2   : > { %520 = vrot.lane.b32.xlu0 %v1012_v47, %s1267_s26  ;;  %s847_s26 = scalar_lea.sflag [#allocation4], %s1505_s16 }
  0xc3   : > { %p1173_p7 = pnand %p1172_p4, %p1166_p12 }
  0xc5   : > { %575 = vperm.xlu1 %1111, %v557_v48  }
  0xc6   : > { %565 = vperm.xlu0 %1112, %v555_v49  }
  0xc9   : > { %693 = vperm.xlu1 %1111, %v685_v50  }
  0xca   : > { %570 = vperm.xlu0 %1112, %v556_v51  }
  0xcd   : > { %659 = vperm.xlu1 %1111, %v651_v52  }
  0xce   : > { %688 = vperm.xlu0 %1112, %v684_v53  }
  0xd1   : > { %654 = vperm.xlu1 %1111, %v650_v54  }
  0xd2   : > { %774 = vperm.xlu0 %1112, %v771_v55  }
  0xd5   : > { %831 = vrot.lane.b32.xlu1 %v435_v25, %s1635_s14 }
  0xd6   : > { %833 = vrot.lane.b32.xlu0 %v436_v21, %s1635_s14 }
  0xd9   : > { %835 = vrot.lane.b32.xlu1 %v437_v40, %s1635_s14  ;;  %s1622_s14 = sshll.u32 %s1351_s21, 8 }
  0xda   : > { %s1532_s12 = scalar_lea.hbm %s1614_s10, %s1622_s14 }
 0x12f   : > { %v525_v57 = vpop.permute.xlu1 %524 }
 0x130   : > { %v523_v58 = vpop.permute.xlu0 %522 }
 0x131   : > { %v528_v59 = vsel %vm526_vm15, %v523_v58, %v525_v57 }
 0x132   : > { %v548_v60 = vsel %vm533_vm13, %v528_v59, %v532_v56 }
 0x133   : > { %597 = vmatprep.subr.bf16.mxu0 %v548_v60  ;;  %1035 = vmatprep.subr.bf16.mxu1 %v548_v60 }
 0x134   : > { %v521_v62 = vpop.permute.xlu0 %520 }
 0x135   : > { %v527_v63 = vsel %vm526_vm15, %v521_v62, %v523_v58 }
 0x136   : > { %v544_v0 = vsel %vm533_vm13, %v527_v63, %v531_v61 }
 0x137   : > { %598 = vmatpush1.bf16.msra.mxu0 %v544_v0  ;;  %1037 = vmatpush1.bf16.msra.mxu1 %v544_v0 }
 0x13a   : > { %1017 = vmatmul.mubr.msk.bf16.vlgmr.msra.gmra.mrb[0].mxu0 %vm588_vm0, %v1116_v2  ;;  %1018 = vmatmul.mubr.msk.bf16.vlgmr.msra.gmra.mrb[0].mxu1 %vm588_vm0, %v1117_v3 }
 0x13b   : > { %737 = vmatprep.mubr.bf16.mxu0 %v1264_v1  ;;  %819 = vmatprep.mubr.bf16.mxu1 %v1264_v1 }
 0x140   : > { %v561_v4 = vpop.permute.xlu1 %560 }
 0x144   : > { %v576_v5 = vpop.permute.xlu1 %575 }
 0x145   : > { %v566_v7 = vpop.permute.xlu0 %565 }
 0x148   : > { %v1495_v6 = vpop.permute.xlu1 %693 }
 0x149   : > { %v571_v41 = vpop.permute.xlu0 %570 }
 0x14c   : > { %v1497_v8 = vpop.permute.xlu1 %659 }
 0x14d   : > { %v689_v45 = vpop.permute.xlu0 %688 }
 0x150   : > { %v655_v22 = vpop.permute.xlu1 %654 }
 0x20d   : > { %v629_v9 = vpop.f32.mrb[0].mxu0  ;;  %v639_v10 = vpop.f32.mrb[0].mxu1 }
 0x20e   : > { %v631_v11 = vpop.f32.mrb[1].mxu0  ;;  %v641_v12 = vpop.f32.mrb[1].mxu1  ;;  %v630_v15 = vadd.f32 %v629_v9, %v561_v4  ;;  %v640_v42 = vadd.f32 %v639_v10, %v571_v41 }
 0x20f   : > { %v633_v13 = vpop.f32.mrb[2].mxu0  ;;  %v643_v14 = vpop.f32.mrb[2].mxu1  ;;  %v632_v19 = vadd.f32 %v631_v11, %v561_v4  ;;  %v642_v43 = vadd.f32 %v641_v12, %v571_v41 }
 0x210   : > { %v634_v16 = vadd.f32 %v633_v13, %v566_v7  ;;  %v635_v17 = vpop.f32.mrb[3].mxu0  ;;  %v645_v18 = vpop.f32.mrb[3].mxu1  ;;  %v662_v28 = vadd.f32 %v655_v22, %v630_v15  ;;  %v644_v44 = vadd.f32 %v643_v14, %v576_v5  ;;  %v1039_v47 = vadd.f32 %v689_v45, %v640_v42 }
 0x211   : > { %v636_v20 = vadd.f32 %v635_v17, %v566_v7  ;;  %v663_v29 = vadd.f32 %v655_v22, %v632_v19  ;;  %v646_v46 = vadd.f32 %v645_v18, %v576_v5  ;;  %v1042_v49 = vadd.f32 %v689_v45, %v642_v43 }
 0x212   : > { %v664_v1 = vadd.f32 %v1497_v8, %v634_v16  ;;  %v682_v21 = vpack.c.bf16 %v634_v16, %v630_v15  ;;  %v1045_v52 = vadd.f32 %v1495_v6, %v644_v44  ;;  %v768_v15 = vld [vmem:[%s1612_s8] sm:$0xf] }
 0x213   : > { %v665_v23 = vadd.f32 %v1497_v8, %v636_v20  ;;  %v683_v24 = vpack.c.bf16 %v636_v20, %v632_v19  ;;  %v1048_v55 = vadd.f32 %v1495_v6, %v646_v46 }
 0x214   : > { %v668_v25 = vmul.f32 0.5, %v664_v1 }
 0x215   : > { %v669_v26 = vmul.f32 0.5, %v665_v23  ;;  %705 = vmatprep.subr.bf16.mxu0 %v683_v24 }
 0x216   : > { %1119 = vtanh.f32 %v668_v25  ;;  %706 = vmatpush1.bf16.msra.mxu0 %v682_v21 }
 0x217   : > { %1121 = vtanh.f32 %v669_v26 }
 0x218   : > { %1123 = vtanh.f32 %v662_v28 }
 0x219   : > { %1021 = vmatmul.mubr.msk.bf16.vlgmr.msra.gmra.mrb[4].mxu0 %vm701_vm1, %v1118_v27  ;;  %1125 = vtanh.f32 %v663_v29 }
 0x220   : > { %v1120_v30 = vpop.eup %1119 }
 0x221   : > { %v1122_v31 = vpop.eup %1121  ;;  %v672_v32 = vmul.f32 0.5, %v1120_v30 }
 0x222   : > { %v673_v33 = vmul.f32 0.5, %v1122_v31  ;;  %v1124_v35 = vpop.eup %1123 }
 0x223   : > { %v674_v34 = vadd.f32 0.5, %v672_v32  ;;  %v1126_v37 = vpop.eup %1125 }
 0x224   : > { %v675_v36 = vadd.f32 0.5, %v673_v33 }
 0x225   : > { %v676_v38 = vmul.f32 %v1124_v35, %v674_v34 }
 0x226   : > { %v677_v39 = vmul.f32 %v1126_v37, %v675_v36 }
 0x227   : > { %678 = vst [vmem:[%s1510_s22] sm:$0xff] %v676_v38 }
 0x228   : > { %679 = vst [vmem:[%s1510_s22 + $0x8] sm:$0xff] %v677_v39 }
 0x2ec   : > { %v739_v48 = vpop.f32.mrb[4].mxu0 }
 0x2ed   : > { %v1040_v50 = vadd.f32 %v1039_v47, %v739_v48  ;;  %v741_v51 = vpop.f32.mrb[5].mxu0 }
 0x2ee   : > { %v1043_v53 = vadd.f32 %v1042_v49, %v741_v51  ;;  %v743_v54 = vpop.f32.mrb[6].mxu0 }
 0x2ef   : > { %v1046_v56 = vadd.f32 %v1045_v52, %v743_v54  ;;  %v745_v57 = vpop.f32.mrb[7].mxu0  ;;  %v752_v63 = vadd.f32 %v1040_v50, %v655_v22 }
 0x2f0   : > { %v1049_v58 = vadd.f32 %v1048_v55, %v745_v57  ;;  %v753_v0 = vadd.f32 %v1043_v53, %v655_v22 }
 0x2f1   : > { %v754_v59 = vadd.f32 %v1046_v56, %v1497_v8 }
 0x2f2   : > { %v755_v60 = vadd.f32 %v1049_v58, %v1497_v8 }
 0x2f3   : > { %v758_v61 = vmul.f32 0.5, %v754_v59 }
 0x2f4   : > { %v759_v62 = vmul.f32 0.5, %v755_v60 }
 0x2f5   : > { %1127 = vtanh.f32 %v758_v61 }
 0x2f6   : > { %1129 = vtanh.f32 %v759_v62 }
 0x2f7   : > { %1131 = vtanh.f32 %v752_v63 }
 0x2f8   : > { %1133 = vtanh.f32 %v753_v0 }
 0x2ff   : > { %v1128_v2 = vpop.eup %1127 }
 0x300   : > { %v1130_v3 = vpop.eup %1129  ;;  %v762_v4 = vmul.f32 0.5, %v1128_v2 }
 0x301   : > { %v763_v5 = vmul.f32 0.5, %v1130_v3  ;;  %v1132_v7 = vpop.eup %1131 }
 0x302   : > { %v764_v6 = vadd.f32 0.5, %v762_v4  ;;  %v1134_v8 = vpop.eup %1133 }
 0x303   : > { %v765_v9 = vadd.f32 0.5, %v763_v5 }
 0x304   : > { %v766_v10 = vmul.f32 %v1132_v7, %v764_v6 }
 0x305   : > { %v767_v11 = vmul.f32 %v1134_v8, %v765_v9 }
 0x306   : > { %v769_v12 = vpack.c.bf16 %v766_v10, %v766_v10 }
 0x307   : > { %v770_v13 = vpack.c.bf16 %v767_v11, %v767_v11 }
 0x308   : > { %v782_v14 = vsel %vm533_vm13, %v769_v12, 0 }
 0x309   : > { %1022 = vmatprep.subr.msk.bf16.mxu1 %vm533_vm13, %v770_v13 }
 0x30a   : > { %788 = vmatpush1.bf16.msra.mxu1 %v782_v14 }
 0x30d   : > { %1023 = vmatmul.mubr.msk.bf16.vlgmr.msra.gmra.mrb[4].mxu1 %vm777_vm2, %v768_v15 }
 0x30e   : > { %1176 = shalt.err (!%p1173_p7)
}
 0x30f   : > { %s1177_s22 = scalar_lea.hbm %s1532_s12, 256  ;;  %s1181_s24 = scalar_lea.hbm %s1614_s10, 512 }
 0x310   : > { %p1178_p8 = scmp.ne.s32.totalorder %s1532_s12, %s1177_s22  ;;  %p1182_p1 = scmp.lt.u32.totalorder %s1532_s12, %s1614_s10 }
 0x311   : > { %p1183_p0 = scmp.lt.u32.totalorder %s1181_s24, %s1177_s22  ;;  %p1185_p6 = scmp.lt.u32.totalorder %s1177_s22, %s1532_s12 }
 0x312   : > { %p1179_p11 = pnand %p1178_p8, %p1636_p9 }
 0x313   : > { %p1184_p5 = por %p1183_p0, %p1182_p1 }
 0x314   : > { %p1180_p13 = pneg %p1179_p11 }
 0x315   : > { %p1186_p10 = por %p1185_p6, %p1184_p5 }
 0x317   : > { %p1187_p12 = pnand %p1186_p10, %p1180_p13 }
 0x319   : > { %1190 = shalt.err (!%p1187_p12)
}
 0x31a   : > { %1056 = dma.vmem_to_hbm [thread:$0]  (%p1636_p9), %s867_s0, 256, %s1532_s12, %s847_s26   ;;  %v832_v16 = vpop.permute.xlu1 %831  ;;  %v775_v17 = vpop.permute.xlu0 %774 }
 0x31b   : > { %s1637_s14 = sshll.u32 %s1505_s16, 4  ;;  %s1638_s0 = sshll.u32 %s1351_s21, 8 }
 0x31c   : > { %s418_s13 = scalar_lea.vmem [#allocation6], %s1637_s14  ;;  %s1561_s22 = scalar_lea.hbm %s1615_s11, %s1638_s0 }
 0x31d   : > { %s880_s25 = sshll.u32 %s418_s13, 4  ;;  %s852_s30 = scalar_lea.sflag [#allocation7], %s1505_s16  ;;  %s1563_s25 = int_to_ptr.vmem [resolvable:$true] %s880_s25 }
 0x31e   : > { %v836_v18 = vpop.permute.xlu1 %835  ;;  %v834_v19 = vpop.permute.xlu0 %833  ;;  %s1191_s29 = scalar_lea.vmem %s1563_s25, 256  ;;  %s1269_s24 = smov [#allocation6]  }
 0x31f   : > { %v839_v22 = vsel %vm509_vm11, %v834_v19, %v836_v18  ;;  %v838_v23 = vsel %vm509_vm11, %v832_v16, %v834_v19  ;;  %p1192_p2 = scmp.ne.s32.totalorder %s1563_s25, %s1191_s29  ;;  %s1195_s21 = sshll.u32 %s1269_s24, 4  ;;  %s1196_s21 = int_to_ptr.vmem [resolvable:$false] %s1195_s21 }
 0x320   : > { %s1197_s15 = scalar_lea.vmem %s1196_s21, 512  ;;  %p1198_p7 = scmp.lt.s32.totalorder %s1563_s25, %s1196_s21 }
 0x321   : > { %p1193_p3 = pnand %p1192_p2, %p1636_p9  ;;  %p1199_p8 = scmp.lt.s32.totalorder %s1197_s15, %s1191_s29 }
 0x323   : > { %p1194_p4 = pneg %p1193_p3  ;;  %p1200_p11 = por %p1199_p8, %p1198_p7 }
 0x325   : > { %p1201_p13 = pnand %p1200_p11, %p1194_p4 }
 0x3e0   : > { %v821_v20 = vpop.f32.mrb[4].mxu1 }
 0x3e1   : > { %v822_v1 = vadd.f32 %v821_v20, %v775_v17  ;;  %v823_v21 = vpop.f32.mrb[5].mxu1 }
 0x3e2   : > { %v824_v24 = vadd.f32 %v823_v21, %v775_v17  ;;  %v825_v25 = vpop.f32.mrb[6].mxu1 }
 0x3e3   : > { %v842_v26 = vadd.f32 %v838_v23, %v822_v1  ;;  %v826_v27 = vpop.f32.mrb[7].mxu1 }
 0x3e4   : > { %v843_v28 = vadd.f32 %v839_v22, %v824_v24 }
 0x3e5   : > { %844 = vst [vmem:[%s418_s13] sm:$0xff] %v842_v26 }
 0x3e6   : > { %845 = vst [vmem:[%s418_s13 + $0x8] sm:$0xff] %v843_v28 }
 0x3e7   : > { %1204 = shalt.err (!%p1201_p13)
}
 0x3e8   : > { %s1205_s16 = scalar_lea.hbm %s1561_s22, 256  ;;  %s1209_s0 = scalar_lea.hbm %s1615_s11, 512 }
 0x3e9   : > { %p1206_p1 = scmp.ne.s32.totalorder %s1561_s22, %s1205_s16  ;;  %p1210_p6 = scmp.lt.u32.totalorder %s1561_s22, %s1615_s11 }
 0x3ea   : > { %p1211_p10 = scmp.lt.u32.totalorder %s1209_s0, %s1205_s16  ;;  %p1213_p2 = scmp.lt.u32.totalorder %s1205_s16, %s1561_s22 }
 0x3eb   : > { %p1207_p0 = pnand %p1206_p1, %p1636_p9 }
 0x3ec   : > { %p1212_p12 = por %p1211_p10, %p1210_p6 }
 0x3ed   : > { %p1208_p5 = pneg %p1207_p0 }
 0x3ee   : > { %p1214_p3 = por %p1213_p2, %p1212_p12 }
 0x3f0   : > { %p1215_p4 = pnand %p1214_p3, %p1208_p5 }
 0x3f2   : > { %1218 = shalt.err (!%p1215_p4)
}
 0x3f3   : > { %1057 = dma.vmem_to_hbm [thread:$0]  (%p1636_p9), %s1563_s25, 256, %s1561_s22, %s852_s30  }
 0x3f4 PF: > { %p1073_p7 = scmp.ge.s32.totalorder %s1261_s20, 2  ;;  %s892_s29 = sand.u32 1, %s1249_s17  }
 0x3f5   : > { %p1639_p8 = scmp.ne.s32.totalorder %s1626_s28, 0  ;;  %s893_s24 = scalar_lea.sflag [#allocation4], %s892_s29 }
 0x3f7   : > { %p1065_p11 = pnand %p1073_p7, %p1639_p8 }
 0x3f9   : > { %1240 = dma.done.wait (!%p1065_p11), %s893_s24, 256  }
 0x3fa   : > { %1242 = vsyncadd (!%p1065_p11), %s893_s24, 4294967040  ;;  %s902_s21 = scalar_lea.sflag [#allocation7], %s892_s29 }
 0x3fb   : > { %1244 = dma.done.wait (!%p1065_p11), %s902_s21, 256  }
 0x3fc   : > { %1246 = vsyncadd (!%p1065_p11), %s902_s21, 4294967040  ;;  %s1640_s27 = sld [smem:[#allocation11_spill]]  ;;  %p26_p9 = scmp.ge.s32.totalorder %s1355_s23, 4  }
 0x3fd   : > { %s1641_s17 = smov %s1253_s18  ;;  %s1642_s18 = smov %s1257_s19 }
 0x3fe   : > { %s1644_s20 = smov %s1355_s23  ;;  %28 = sbr.rel (!%p26_p9) target bundleno = 8 (0x8), region = 121 }
 0x402   : > { %s1643_s19 = smov %s1640_s27 }
 0x405   :  { %907 = vsyncpa [#allocation3], 1 }
 0x406   :  { %909 = vsyncpa [#allocation3 + $0x1], 1 }
 0x407   :  { %910 = vsyncpa [#allocation4], 1 }
 0x408   :  { %912 = vsyncpa [#allocation4 + $0x1], 1 }
 0x409   :  { %913 = vsyncpa [#allocation7], 1 }
 0x40a   :  { %915 = vsyncpa [#allocation7 + $0x1], 1 }

</bundles_post_ra>
